<compile_context>
chip_gen: v5e
topology: v5e:2x2
jax: 0.10.0
libtpu: 0.0.40
codegen_flags: <defaults>
</compile_context>

<pallas_src>
import functools

import jax
import jax.numpy as jnp
from jax.experimental import pallas as pl
from jax.experimental.pallas import tpu as pltpu


LANE = 128       # lane multiple (safe on every MXU generation)
SUB_F32 = 8      # f32 sublane tile
SUB_BF16 = 16    # bf16 sublane tile


def _round_up(x, m):
    return (x + m - 1) // m * m


def _tpu_config():
    """(vmem_budget_bytes, use_bf16_gelu) derived from the local chip."""
    vmem_cap = 64 * 1024 * 1024              # conservative default (v7x-sized)
    try:
        vmem_cap = int(pltpu.get_tpu_info().vmem_capacity_bytes)
    except Exception:
        pass
    kind = ""
    try:
        kind = jax.devices()[0].device_kind.lower()
    except Exception:
        pass
    # bf16 VPU/EUP exists on v6e/v7x only; keep GELU in f32 elsewhere (v5e).
    use_bf16_gelu = ("v6" in kind) or ("v7" in kind)
    # leave headroom for Mosaic-internal scratch / pipeline bookkeeping.
    vmem_budget = min(vmem_cap * 3 // 4, 96 * 1024 * 1024)
    return vmem_budget, use_bf16_gelu


def _pick_tiles(B, T, Kp, Dp, NCp, vmem_budget, block_b):
    """Choose (BB, Bp, TC, Tp) under the chip-derived VMEM budget."""
    # --- batch block ---
    if block_b is not None:
        BB = block_b
    elif B <= 8:
        BB = B                                  # one block, zero padded rows
    else:
        # >= 2 sublane-aligned blocks: feeds both v7x TensorCores and
        # amortizes the ~0.35us/step overhead; cap bounds the patch tile.
        BB = min(64, _round_up(-(-B // 2), SUB_F32))
    Bp = _round_up(B, BB)
    if Bp // BB > 1 and BB % SUB_F32 != 0:
        BB = _round_up(BB, SUB_F32)             # multi-block => sublane aligned
        Bp = _round_up(B, BB)

    # --- token chunk: target >= 512 MXU rows/step, fit the VMEM budget ---
    Tp0 = _round_up(T, SUB_BF16)
    TC = min(Tp0, _round_up(max(SUB_BF16, -(-512 // BB)), SUB_BF16))

    def step_vmem(tc):
        return (2 * BB * tc * Kp * 2            # double-buffered bf16 patch tile
                + 2 * (Kp * Dp + Dp * NCp) * 2  # weights (worst case 2x buffered)
                + BB * tc * Dp * 4              # f32 token chunk
                + BB * Dp * 4                   # pooled-sum scratch
                + 2 * BB * (Dp + NCp) * 4)      # double-buffered f32 outputs

    while TC > SUB_BF16 and step_vmem(TC) > vmem_budget:
        TC -= SUB_BF16
    Tp = _round_up(Tp0, TC)
    return BB, Bp, TC, Tp


def _basenet_kernel(patches_ref, wp_ref, wfc_ref, bfc_ref,
                    feat_ref, logit_ref, acc_ref, *, inv_t, gelu_bf16):
    # patches: [BB, TC, Kp] bf16   wp:  [Kp, Dp]  bf16
    # wfc:     [Dp, NCp]    bf16   bfc: [1, NCp]  f32
    # feat:    [BB, Dp]     f32    logit: [BB, NCp] f32
    # acc:     [BB, Dp]     f32 scratch (pooled token sum across token chunks)
    tj = pl.program_id(1)

    @pl.when(tj == 0)
    def _():
        acc_ref[...] = jnp.zeros_like(acc_ref)

    bb, tc, kp = patches_ref.shape
    # "backbone": patch embedding for this token chunk (MXU, bf16 in / f32 acc)
    tokens = jnp.dot(patches_ref[...].reshape(bb * tc, kp), wp_ref[...],
                     preferred_element_type=jnp.float32)        # [BB*TC, Dp]
    if gelu_bf16:
        # v6e/v7x: bf16 VPU/EUP halves the per-element GELU cost; the pooled
        # sum below still accumulates in f32.
        tokens = jax.nn.gelu(tokens.astype(jnp.bfloat16),
                             approximate=True).astype(jnp.float32)
    else:
        tokens = jax.nn.gelu(tokens, approximate=True)

    # per-image partial token sum: tile-aligned reshape + sublane-axis reduce.
    acc_ref[...] += jnp.sum(tokens.reshape(bb, tc, tokens.shape[-1]), axis=1)

    @pl.when(tj == pl.num_programs(1) - 1)
    def _():
        # Padded token rows contribute gelu(0) == 0, so dividing by the true
        # token count is still the exact mean.
        feats = acc_ref[...] * inv_t
        feat_ref[...] = feats.astype(feat_ref.dtype)            # [BB, Dp]
        # fc head: logits = features @ W_fc + b_fc (small MXU op + bias bcast)
        logits = jnp.dot(feats.astype(wfc_ref.dtype), wfc_ref[...],
                         preferred_element_type=jnp.float32) + bfc_ref[...]
        logit_ref[...] = logits.astype(logit_ref.dtype)         # [BB, NCp]


@functools.partial(jax.jit, static_argnames=("patch", "block_b"))
def basenet_forward(x, w_patch, w_fc, b_fc, *, patch=4, block_b=None):
    """BaseNet.forward.  Returns {'logits': ..., 'features': ...}."""
    B, C, H, W = x.shape
    P = patch
    Th, Tw = H // P, W // P
    T = Th * Tw
    patch_dim = C * P * P
    D = w_patch.shape[1]          # feature_dim (backbone.out_dim)
    NC = w_fc.shape[1]            # nb_classes

    vmem_budget, gelu_bf16 = _tpu_config()

    # padded, MXU/vreg-friendly dims (128-lane multiples work on all gens).
    # TODO(synk): bump lane pads to 256 multiples when targeting only v6e/v7x.
    Kp = _round_up(patch_dim, LANE)
    Dp = _round_up(D, LANE)
    NCp = _round_up(NC, LANE)
    BB, Bp, TC, Tp = _pick_tiles(B, T, Kp, Dp, NCp, vmem_budget, block_b)
    n_blocks = Bp // BB
    n_tchunks = Tp // TC

    # --- glue: im2col NCHW -> [Bp, Tp, Kp] bf16 patch tensor (plain JAX) ---
    # Cast to bf16 *before* the transpose so XLA moves half the bytes.
    # TODO(synk): with NHWC inputs upstream this transpose becomes a reshape.
    patches = x.astype(jnp.bfloat16).reshape(B, C, Th, P, Tw, P)
    patches = patches.transpose(0, 2, 4, 1, 3, 5)        # [B, Th, Tw, C, p, p]
    patches = patches.reshape(B, T, patch_dim)
    patches = jnp.pad(patches,
                      ((0, Bp - B), (0, Tp - T), (0, Kp - patch_dim)))

    wp = jnp.pad(w_patch, ((0, Kp - patch_dim), (0, Dp - D))).astype(jnp.bfloat16)
    wfc = jnp.pad(w_fc, ((0, Dp - D), (0, NCp - NC))).astype(jnp.bfloat16)
    bfc = jnp.pad(b_fc.reshape(1, NC), ((0, 0), (0, NCp - NC))).astype(jnp.float32)

    kernel = functools.partial(_basenet_kernel, inv_t=1.0 / T,
                               gelu_bf16=gelu_bf16)

    flops = 2 * Bp * Tp * Kp * Dp + 2 * Bp * Dp * NCp
    bytes_accessed = (patches.size * 2 + wp.size * 2 + wfc.size * 2
                      + bfc.size * 4 + Bp * Dp * 4 + Bp * NCp * 4)

    feats, logits = pl.pallas_call(
        kernel,
        out_shape=(
            jax.ShapeDtypeStruct((Bp, Dp), jnp.float32),
            jax.ShapeDtypeStruct((Bp, NCp), jnp.float32),
        ),
        grid_spec=pltpu.PrefetchScalarGridSpec(
            num_scalar_prefetch=0,
            grid=(n_blocks, n_tchunks),
            in_specs=[
                # streamed patch tile: one (batch block, token chunk) per step
                pl.BlockSpec((BB, TC, Kp), lambda i, j: (i, j, 0)),
                # resident weights / bias (same block every step)
                pl.BlockSpec((Kp, Dp), lambda i, j: (0, 0)),
                pl.BlockSpec((Dp, NCp), lambda i, j: (0, 0)),
                pl.BlockSpec((1, NCp), lambda i, j: (0, 0)),
            ],
            out_specs=[
                pl.BlockSpec((BB, Dp), lambda i, j: (i, 0)),
                pl.BlockSpec((BB, NCp), lambda i, j: (i, 0)),
            ],
            scratch_shapes=[pltpu.VMEM((BB, Dp), jnp.float32)],
        ),
        compiler_params=pltpu.CompilerParams(
            dimension_semantics=("parallel", "arbitrary"),
            vmem_limit_bytes=vmem_budget,
        ),
        cost_estimate=pl.CostEstimate(
            flops=flops,
            transcendentals=Bp * Tp * Dp,
            bytes_accessed=bytes_accessed,
        ),
    )(patches, wp, wfc, bfc)

    # mirrors: out = fc(features); out.update({'features': features})
    return {"logits": logits[:B, :NC], "features": feats[:B, :D]}


if __name__ == "__main__":
    # small shapes consistent with the module's forward
    B, C, H, W = 2, 4, 16, 16      # input image batch (NCHW)
    PATCH = 4
    FEATURE_DIM = 32               # stands in for backbone.out_dim (768)
    NB_CLASSES = 8                 # fc head width

    key = jax.random.PRNGKey(0)
    kx, kp, kw, kb = jax.random.split(key, 4)

    x = jax.random.normal(kx, (B, C, H, W), dtype=jnp.float32)
    w_patch = 0.05 * jax.random.normal(kp, (C * PATCH * PATCH, FEATURE_DIM),
                                       dtype=jnp.float32)
    w_fc = 0.05 * jax.random.normal(kw, (FEATURE_DIM, NB_CLASSES),
                                    dtype=jnp.float32)
    b_fc = 0.01 * jax.random.normal(kb, (1, NB_CLASSES), dtype=jnp.float32)

    out = basenet_forward(x, w_patch, w_fc, b_fc, patch=PATCH)
    jax.block_until_ready(out)

    assert out["features"].shape == (B, FEATURE_DIM)
    assert out["logits"].shape == (B, NB_CLASSES)

    # reference with the same bf16-operand / f32-accumulate / gelu-dtype scheme
    _, gelu_bf16 = _tpu_config()
    patches = x.reshape(B, C, H // PATCH, PATCH, W // PATCH, PATCH)
    patches = patches.transpose(0, 2, 4, 1, 3, 5).reshape(B, -1, C * PATCH * PATCH)
    tok = jnp.dot(patches.astype(jnp.bfloat16), w_patch.astype(jnp.bfloat16),
                  preferred_element_type=jnp.float32)
    if gelu_bf16:
        tok = jax.nn.gelu(tok.astype(jnp.bfloat16),
                          approximate=True).astype(jnp.float32)
    else:
        tok = jax.nn.gelu(tok, approximate=True)
    feats_ref = tok.mean(axis=1)
    logits_ref = jnp.dot(feats_ref.astype(jnp.bfloat16), w_fc.astype(jnp.bfloat16),
                         preferred_element_type=jnp.float32) + b_fc
    assert jnp.allclose(out["features"], feats_ref, atol=5e-3, rtol=5e-3)
    assert jnp.allclose(out["logits"], logits_ref, atol=5e-3, rtol=5e-3)

    # loose sanity check against full-f32 math (bf16 cast error budget)
    tok32 = jax.nn.gelu(patches.astype(jnp.float32) @ w_patch, approximate=True)
    feats32 = tok32.mean(axis=1)
    logits32 = feats32 @ w_fc + b_fc
    assert jnp.allclose(out["features"], feats32, atol=5e-2, rtol=5e-2)
    assert jnp.allclose(out["logits"], logits32, atol=5e-2, rtol=5e-2)

    print("KERNEL_OK")
</pallas_src>

<mosaic_0001>
module attributes {stable_mosaic.version = 11 : i64} {
  func.func @_basenet_kernel(%arg0: i32, %arg1: i32, %arg2: memref<2x16x128xbf16, #tpu.memory_space<vmem>>, %arg3: memref<128x128xbf16, #tpu.memory_space<vmem>>, %arg4: memref<128x128xbf16, #tpu.memory_space<vmem>>, %arg5: memref<1x128xf32, #tpu.memory_space<vmem>>, %arg6: memref<2x128xf32, #tpu.memory_space<vmem>>, %arg7: memref<2x128xf32, #tpu.memory_space<vmem>>, %arg8: memref<2x128xf32, #tpu.memory_space<vmem>>) attributes {dimension_semantics = [#tpu.dimension_semantics<parallel>, #tpu.dimension_semantics<arbitrary>], iteration_bounds = array<i64: 1, 1>, scalar_prefetch = 0 : i64, scratch_operands = 1 : i64, tpu.core_type = #tpu.core_type<tc>, window_params = [{transform_indices = @transform_0, window_bounds = array<i64: 2, 16, 128>}, {pipeline_mode = #tpu.pipeline_mode<synchronous>, transform_indices = @transform_1, window_bounds = array<i64: 128, 128>}, {pipeline_mode = #tpu.pipeline_mode<synchronous>, transform_indices = @transform_2, window_bounds = array<i64: 128, 128>}, {pipeline_mode = #tpu.pipeline_mode<synchronous>, transform_indices = @transform_3, window_bounds = array<i64: 1, 128>}, {transform_indices = @transform_4, window_bounds = array<i64: 2, 128>}, {transform_indices = @transform_5, window_bounds = array<i64: 2, 128>}]} {
    %c0_i32 = arith.constant 0 : i32
    %0 = arith.cmpi eq, %arg1, %c0_i32 : i32
    %1 = arith.extui %0 : i1 to i32
    %c0_i32_0 = arith.constant 0 : i32
    %2 = arith.cmpi ne, %1, %c0_i32_0 : i32
    scf.if %2 {
      %cst_16 = arith.constant 0.000000e+00 : f32
      %28 = vector.broadcast %cst_16 : f32 to vector<2x128xf32>
      %c0_17 = arith.constant 0 : index
      %c0_18 = arith.constant 0 : index
      %29 = vector.load %arg8[%c0_17, %c0_18] : memref<2x128xf32, #tpu.memory_space<vmem>>, vector<2x128xf32>
      tpu.vector_store %arg8[%c0_17, %c0_18], %28 {strides = array<i32>} : memref<2x128xf32, #tpu.memory_space<vmem>>, vector<2x128xf32>,
    } else {
    }
    %c0 = arith.constant 0 : index
    %c0_1 = arith.constant 0 : index
    %c0_2 = arith.constant 0 : index
    %3 = vector.load %arg2[%c0, %c0_1, %c0_2] : memref<2x16x128xbf16, #tpu.memory_space<vmem>>, vector<2x16x128xbf16>
    %4 = vector.shape_cast %3 : vector<2x16x128xbf16> to vector<32x128xbf16>
    %c0_3 = arith.constant 0 : index
    %c0_4 = arith.constant 0 : index
    %5 = vector.load %arg3[%c0_3, %c0_4] : memref<128x128xbf16, #tpu.memory_space<vmem>>, vector<128x128xbf16>
    %cst = arith.constant dense<0.000000e+00> : vector<32x128xf32>
    %6 = tpu.matmul %4, %5, %cst {dimension_numbers = #tpu.dot_dimension_numbers<[1], [0], [0], [1], [0, 0, 1, 1], [], []>} : vector<32x128xbf16>, vector<128x128xbf16>, vector<32x128xf32> -> vector<32x128xf32>
    %7 = arith.mulf %6, %6 : vector<32x128xf32>
    %8 = arith.mulf %6, %7 : vector<32x128xf32>
    %cst_5 = arith.constant 4.471500e-02 : f32
    %9 = vector.broadcast %cst_5 : f32 to vector<32x128xf32>
    %10 = arith.mulf %9, %8 : vector<32x128xf32>
    %11 = arith.addf %6, %10 : vector<32x128xf32>
    %cst_6 = arith.constant 0.797884583 : f32
    %12 = vector.broadcast %cst_6 : f32 to vector<32x128xf32>
    %13 = arith.mulf %12, %11 : vector<32x128xf32>
    %14 = math.tanh %13 : vector<32x128xf32>
    %cst_7 = arith.constant 1.000000e+00 : f32
    %15 = vector.broadcast %cst_7 : f32 to vector<32x128xf32>
    %16 = arith.addf %15, %14 : vector<32x128xf32>
    %cst_8 = arith.constant 5.000000e-01 : f32
    %17 = vector.broadcast %cst_8 : f32 to vector<32x128xf32>
    %18 = arith.mulf %17, %16 : vector<32x128xf32>
    %19 = arith.mulf %6, %18 : vector<32x128xf32>
    %c0_9 = arith.constant 0 : index
    %c0_10 = arith.constant 0 : index
    %20 = vector.load %arg8[%c0_9, %c0_10] : memref<2x128xf32, #tpu.memory_space<vmem>>, vector<2x128xf32>
    %21 = vector.shape_cast %19 : vector<32x128xf32> to vector<2x16x128xf32>
    %cst_11 = arith.constant dense<0.000000e+00> : vector<2x128xf32>
    %22 = vector.multi_reduction <add>, %21, %cst_11 [1] : vector<2x16x128xf32> to vector<2x128xf32>
    %23 = arith.addf %20, %22 : vector<2x128xf32>
    %c0_12 = arith.constant 0 : index
    %c0_13 = arith.constant 0 : index
    %24 = vector.load %arg8[%c0_12, %c0_13] : memref<2x128xf32, #tpu.memory_space<vmem>>, vector<2x128xf32>
    tpu.vector_store %arg8[%c0_12, %c0_13], %23 {strides = array<i32>} : memref<2x128xf32, #tpu.memory_space<vmem>>, vector<2x128xf32>,
    %c0_i32_14 = arith.constant 0 : i32
    %25 = arith.cmpi eq, %arg1, %c0_i32_14 : i32
    %26 = arith.extui %25 : i1 to i32
    %c0_i32_15 = arith.constant 0 : i32
    %27 = arith.cmpi ne, %26, %c0_i32_15 : i32
    scf.if %27 {
      %c0_16 = arith.constant 0 : index
      %c0_17 = arith.constant 0 : index
      %28 = vector.load %arg8[%c0_16, %c0_17] : memref<2x128xf32, #tpu.memory_space<vmem>>, vector<2x128xf32>
      %cst_18 = arith.constant 6.250000e-02 : f32
      %29 = vector.broadcast %cst_18 : f32 to vector<2x128xf32>
      %30 = arith.mulf %28, %29 : vector<2x128xf32>
      %c0_19 = arith.constant 0 : index
      %c0_20 = arith.constant 0 : index
      %31 = vector.load %arg6[%c0_19, %c0_20] : memref<2x128xf32, #tpu.memory_space<vmem>>, vector<2x128xf32>
      tpu.vector_store %arg6[%c0_19, %c0_20], %30 {strides = array<i32>} : memref<2x128xf32, #tpu.memory_space<vmem>>, vector<2x128xf32>,
      %32 = arith.truncf %30 : vector<2x128xf32> to vector<2x128xbf16>
      %c0_21 = arith.constant 0 : index
      %c0_22 = arith.constant 0 : index
      %33 = vector.load %arg4[%c0_21, %c0_22] : memref<128x128xbf16, #tpu.memory_space<vmem>>, vector<128x128xbf16>
      %cst_23 = arith.constant dense<0.000000e+00> : vector<2x128xf32>
      %34 = tpu.matmul %32, %33, %cst_23 {dimension_numbers = #tpu.dot_dimension_numbers<[1], [0], [0], [1], [0, 0, 1, 1], [], []>} : vector<2x128xbf16>, vector<128x128xbf16>, vector<2x128xf32> -> vector<2x128xf32>
      %c0_24 = arith.constant 0 : index
      %c0_25 = arith.constant 0 : index
      %35 = vector.load %arg5[%c0_24, %c0_25] : memref<1x128xf32, #tpu.memory_space<vmem>>, vector<1x128xf32>
      %36 = vector.broadcast %35 : vector<1x128xf32> to vector<2x128xf32>
      %37 = arith.addf %34, %36 : vector<2x128xf32>
      %c0_26 = arith.constant 0 : index
      %c0_27 = arith.constant 0 : index
      %38 = vector.load %arg7[%c0_26, %c0_27] : memref<2x128xf32, #tpu.memory_space<vmem>>, vector<2x128xf32>
      tpu.vector_store %arg7[%c0_26, %c0_27], %37 {strides = array<i32>} : memref<2x128xf32, #tpu.memory_space<vmem>>, vector<2x128xf32>,
    } else {
    }
    return
  }
  func.func @transform_0(%arg0: i32, %arg1: i32) -> (i32, i32, i32) {
    %c0_i32 = arith.constant 0 : i32
    %c0_i32_0 = arith.constant 0 : i32
    return %arg0, %arg1, %c0_i32 : i32, i32, i32
  }
  func.func @transform_1(%arg0: i32, %arg1: i32) -> (i32, i32) {
    %c0_i32 = arith.constant 0 : i32
    %c0_i32_0 = arith.constant 0 : i32
    %c0_i32_1 = arith.constant 0 : i32
    return %c0_i32, %c0_i32_0 : i32, i32
  }
  func.func @transform_2(%arg0: i32, %arg1: i32) -> (i32, i32) {
    %c0_i32 = arith.constant 0 : i32
    %c0_i32_0 = arith.constant 0 : i32
    %c0_i32_1 = arith.constant 0 : i32
    return %c0_i32, %c0_i32_0 : i32, i32
  }
  func.func @transform_3(%arg0: i32, %arg1: i32) -> (i32, i32) {
    %c0_i32 = arith.constant 0 : i32
    %c0_i32_0 = arith.constant 0 : i32
    %c0_i32_1 = arith.constant 0 : i32
    return %c0_i32, %c0_i32_0 : i32, i32
  }
  func.func @transform_4(%arg0: i32, %arg1: i32) -> (i32, i32) {
    %c0_i32 = arith.constant 0 : i32
    %c0_i32_0 = arith.constant 0 : i32
    return %arg0, %c0_i32 : i32, i32
  }
  func.func @transform_5(%arg0: i32, %arg1: i32) -> (i32, i32) {
    %c0_i32 = arith.constant 0 : i32
    %c0_i32_0 = arith.constant 0 : i32
    return %arg0, %c0_i32 : i32, i32
  }
}

</mosaic_0001>

<bundles_post_ra>
// kernel: basenet_forward.1
= control target key start
LH: loop header
LB: loop body
LE: loop exit
PB: predicated region body
PF: predicated region fallthrough
CT: control target
= control target key end

     0   :  { %11 = vsyncpa [#allocation4], 0  ;;  %s562_s0 = inlined_call_operand.vmem [shape: bf16[2,16,128], index: 0, kind: input, shape index: {}]   ;;  %s563_s1 = inlined_call_operand.vmem [shape: bf16[128,128], index: 1, kind: input, shape index: {}]   ;;  %s564_s2 = inlined_call_operand.vmem [shape: bf16[128,128], index: 2, kind: input, shape index: {}]   ;;  %s565_s3 = inlined_call_operand.vmem [shape: f32[1,128], index: 3, kind: input, shape index: {}]   ;;  %s566_s4 = inlined_call_operand.hbm [shape: f32[2,128], index: 4, kind: output, shape index: {0}]   ;;  %s567_s5 = inlined_call_operand.hbm [shape: f32[2,128], index: 5, kind: output, shape index: {1}]  }
   0x1   :  { %v385_v0 = vld [vmem:[%s563_s1 + $0x38] sm:$0xff]  ;;  %v384_v1 = vld [vmem:[%s563_s1 + $0x30] sm:$0xff] }
   0x2   :  { %106 = vmatpush.bf16.msra.mxu0 %v385_v0  ;;  %394 = vmatpush.bf16.msra.mxu2 %v385_v0 }
   0x3   :  { %12 = vsyncpa [#allocation6], 0  ;;  %v383_v2 = vld [vmem:[%s563_s1 + $0x28] sm:$0xff]  ;;  %v382_v3 = vld [vmem:[%s563_s1 + $0x20] sm:$0xff]  ;;  %v466_v28 = vmov 0.0   ;;  %vm178_vm0 = vcmask 1041409  }
   0x4   :  { %v381_v4 = vld [vmem:[%s563_s1 + $0x18] sm:$0xff]  ;;  %v380_v5 = vld [vmem:[%s563_s1 + $0x10] sm:$0xff]  ;;  %v379_v6 = vld [vmem:[%s563_s1 + $0x8] sm:$0xff]  ;;  %25 = vst [vmem:[#allocation2] sm:$0x3] %v466_v28  ;;  %s279_s30 = sshll.u32 %s566_s4, 4  ;;  %s280_s30 = int_to_ptr.hbm [resolvable:$true] %s279_s30 }
   0x5   :  { %v378_v7 = vld [vmem:[%s563_s1] sm:$0xff]  ;;  %v377_v9 = vld [vmem:[%s562_s0 + $0x8] sm:$0xff]  ;;  %v393_v12 = vld [vmem:[%s564_s2 + $0x38] sm:$0xff]  ;;  %s468_s8 = smov [#allocation5]   ;;  %s290_s12 = sshll.u32 %s567_s5, 4  ;;  %s291_s12 = int_to_ptr.hbm [resolvable:$true] %s290_s12 }
   0x6   :  { %107 = vmatpush.bf16.msra.mxu0 %v384_v1  ;;  %395 = vmatpush.bf16.msra.mxu2 %v384_v1  ;;  %v376_v8 = vld [vmem:[%s562_s0] sm:$0xff]  ;;  %v392_v16 = vld [vmem:[%s564_s2 + $0x30] sm:$0xff]  ;;  %v391_v23 = vld [vmem:[%s564_s2 + $0x28] sm:$0xff]  ;;  %s288_s9 = sshll.u32 %s468_s8, 4  ;;  %s289_s9 = int_to_ptr.vmem [resolvable:$true] %s288_s9 }
   0x7   :  { %258 = vmatpush.bf16.msra.mxu1 %v393_v12  ;;  %v390_v30 = vld [vmem:[%s564_s2 + $0x20] sm:$0xff]  ;;  %v389_v36 = vld [vmem:[%s564_s2 + $0x18] sm:$0xff]  ;;  %v388_v41 = vld [vmem:[%s564_s2 + $0x10] sm:$0xff] }
   0x8   :  { %v387_v44 = vld [vmem:[%s564_s2 + $0x8] sm:$0xff]  ;;  %v386_v50 = vld [vmem:[%s564_s2] sm:$0xff]  ;;  %s467_s2 = smov [#allocation3]  }
   0x9   :  { %s277_s27 = sshll.u32 %s467_s2, 4  ;;  %s278_s27 = int_to_ptr.vmem [resolvable:$true] %s277_s27 }
   0xa   :  { %108 = vmatpush.bf16.msra.mxu0 %v383_v2  ;;  %396 = vmatpush.bf16.msra.mxu2 %v383_v2 }
   0xb   :  { %259 = vmatpush.bf16.msra.mxu1 %v392_v16 }
   0xe   :  { %109 = vmatpush.bf16.msra.mxu0 %v382_v3  ;;  %397 = vmatpush.bf16.msra.mxu2 %v382_v3 }
   0xf   :  { %260 = vmatpush.bf16.msra.mxu1 %v391_v23 }
  0x12   :  { %110 = vmatpush.bf16.msra.mxu0 %v381_v4  ;;  %398 = vmatpush.bf16.msra.mxu2 %v381_v4 }
  0x13   :  { %261 = vmatpush.bf16.msra.mxu1 %v390_v30 }
  0x16   :  { %111 = vmatpush.bf16.msra.mxu0 %v380_v5  ;;  %399 = vmatpush.bf16.msra.mxu2 %v380_v5 }
  0x17   :  { %262 = vmatpush.bf16.msra.mxu1 %v389_v36 }
  0x1a   :  { %112 = vmatpush.bf16.msra.mxu0 %v379_v6  ;;  %400 = vmatpush.bf16.msra.mxu2 %v379_v6 }
  0x1b   :  { %263 = vmatpush.bf16.msra.mxu1 %v388_v41 }
  0x1e   :  { %113 = vmatpush.bf16.msra.mxu0 %v378_v7  ;;  %401 = vmatpush.bf16.msra.mxu2 %v378_v7 }
  0x1f   :  { %264 = vmatpush.bf16.msra.mxu1 %v387_v44 }
  0x21   :  { %114 = vmatmul.bf16.vlgmr.msra.gmra.mxu0 %v376_v8  ;;  %119 = vmatmul.bf16.vlgmr.msra.gmra.mxu2 %v377_v9  ;;  %v161_v8 = vld [vmem:[#allocation2] sm:$0x3] }
  0x23   :  { %265 = vmatpush.bf16.msra.mxu1 %v386_v50 }
  0x9e   :  { %v115_v10 = vpop.f32.mrf.mxu0 }
  0x9f   :  { %v125_v11 = vmul.f32 %v115_v10, %v115_v10 }
  0xa1   :  { %v129_v13 = vmul.f32 %v125_v11, %v115_v10 }
  0xa3   :  { %v133_v14 = vmul.f32 0.044715, %v129_v13 }
  0xa4   :  { %v120_v15 = vpop.f32.mrf.mxu2 }
  0xa5   :  { %v137_v17 = vadd.f32 %v133_v14, %v115_v10  ;;  %v127_v18 = vmul.f32 %v120_v15, %v120_v15 }
  0xa6   :  { %v117_v19 = vpop.f32.mrf.mxu0 }
  0xa7   :  { %v141_v20 = vmul.f32 0.7978846, %v137_v17  ;;  %v131_v21 = vmul.f32 %v127_v18, %v120_v15  ;;  %v126_v22 = vmul.f32 %v117_v19, %v117_v19 }
  0xa9   :  { %v135_v24 = vmul.f32 0.044715, %v131_v21  ;;  %v130_v25 = vmul.f32 %v126_v22, %v117_v19  ;;  %406 = vtanh.f32 %v141_v20 }
  0xab   :  { %v139_v26 = vadd.f32 %v135_v24, %v120_v15  ;;  %v134_v27 = vmul.f32 0.044715, %v130_v25 }
  0xac   :  { %v122_v29 = vpop.f32.mrf.mxu2 }
  0xad   :  { %v143_v31 = vmul.f32 0.7978846, %v139_v26  ;;  %v138_v32 = vadd.f32 %v134_v27, %v117_v19  ;;  %v128_v33 = vmul.f32 %v122_v29, %v122_v29 }
  0xaf   :  { %v142_v34 = vmul.f32 0.7978846, %v138_v32  ;;  %v132_v35 = vmul.f32 %v128_v33, %v122_v29  ;;  %408 = vtanh.f32 %v143_v31  ;;  %v407_v37 = vpop.eup %406 }
  0xb0   :  { %v149_v40 = vadd.f32 1.0, %v407_v37 }
  0xb1   :  { %410 = vtanh.f32 %v142_v34  ;;  %v136_v38 = vmul.f32 0.044715, %v132_v35 }
  0xb2   :  { %v153_v46 = vmul.f32 0.5, %v149_v40 }
  0xb3   :  { %v140_v39 = vadd.f32 %v136_v38, %v122_v29 }
  0xb4   :  { %v157_v51 = vmul.f32 %v153_v46, %v115_v10 }
  0xb5   :  { %v144_v42 = vmul.f32 0.7978846, %v140_v39  ;;  %v409_v43 = vpop.eup %408 }
  0xb6   :  { %v151_v48 = vadd.f32 1.0, %v409_v43 }
  0xb7   :  { %v411_v45 = vpop.eup %410  ;;  %412 = vtanh.f32 %v144_v42 }
  0xb8   :  { %v150_v47 = vadd.f32 1.0, %v411_v45  ;;  %v155_v54 = vmul.f32 0.5, %v151_v48 }
  0xba   :  { %v154_v49 = vmul.f32 0.5, %v150_v47  ;;  %v159_v59 = vmul.f32 %v155_v54, %v120_v15  ;;  %v405_v15 = vld [vmem:[%s565_s3] ss:$0 sm:$0xff] }
  0xbc   :  { %v158_v52 = vmul.f32 %v154_v49, %v117_v19 }
  0xbd   :  { %v413_v53 = vpop.eup %412 }
  0xbe   :  { %v162_v55 = vadd.f32 %v158_v52, %v157_v51  ;;  %v152_v56 = vadd.f32 1.0, %v413_v53 }
  0xc0   :  { %v163_v57 = vrot.slane %v162_v55, 4  ;;  %v156_v58 = vmul.f32 0.5, %v152_v56 }
  0xc2   :  { %v164_v60 = vadd.f32 %v163_v57, %v162_v55  ;;  %v160_v61 = vmul.f32 %v156_v58, %v122_v29 }
  0xc4   :  { %v165_v62 = vrot.slane %v164_v60, 2  ;;  %v169_v63 = vadd.f32 %v160_v61, %v159_v59 }
  0xc6   :  { %v170_v0 = vrot.slane %v169_v63, 4  ;;  %v166_v1 = vadd.f32 %v165_v62, %v164_v60 }
  0xc8   :  { %v171_v2 = vadd.f32 %v170_v0, %v169_v63  ;;  %v167_v4 = vrot.slane %v166_v1, 1 }
  0xca   :  { %v172_v3 = vrot.slane %v171_v2, 2  ;;  %v168_v7 = vadd.f32 %v167_v4, %v166_v1 }
  0xcc   :  { %v173_v5 = vadd.f32 %v172_v3, %v171_v2 }
  0xce   :  { %v174_v6 = vrot.slane %v173_v5, 1 }
  0xd0   :  { %v175_v9 = vadd.f32 %v174_v6, %v173_v5 }
  0xd2   :  { %v179_v10 = vsel %vm178_vm0, %v175_v9, %v168_v7 }
  0xd3   :  { %v181_v11 = vadd.f32 %v179_v10, %v161_v8 }
  0xd5   :  { %182 = vst [vmem:[#allocation2] sm:$0x3] %v181_v11 }
  0xdc   :  { %v186_v12 = vld [vmem:[#allocation2] sm:$0x3] }
  0xdd   :  { %v187_v13 = vmul.f32 0.0625, %v186_v12 }
  0xdf   :  { %v189_v14 = vpack.c.bf16 %v187_v13, %v187_v13  ;;  %188 = vst [vmem:[#allocation3] sm:$0x3] %v187_v13 }
  0xe0   :  { %282 = dma.vmem_to_hbm [thread:$0]  %s278_s27, 32, %s280_s30, [#allocation4]  }
  0xe1   :  { %266 = vmatmul.bf16.vlgmr.msra.gmra.mxu1 %v189_v14 }
 0x15e   :  { %v267_v16 = vpop.f32.mrf.mxu1 }
 0x15f   :  { %v268_v17 = vadd.f32 %v405_v15, %v267_v16 }
 0x161   :  { %271 = vst [vmem:[#allocation5] sm:$0x3] %v268_v17 }
 0x162   :  { %293 = dma.vmem_to_hbm [thread:$0]  %s289_s9, 32, %s291_s12, [#allocation6]  }
 0x166   :  { %v269_v18 = vpop.f32.mrf.mxu1 }
 0x167   :  { %462 = dma.done.wait [#allocation4], 32  }
 0x168   :  { %463 = vsyncadd [#allocation4], 4294967264 }
 0x169   :  { %464 = dma.done.wait [#allocation6], 32  }
 0x16a   :  { %465 = vsyncadd [#allocation6], 4294967264 }
 0x16b   :  { %302 = vsyncpa [#allocation4], 1 }
 0x16c   :  { %303 = vsyncpa [#allocation6], 1 }

</bundles_post_ra>
